<compile_context>
chip_gen: v6e
topology: v6e:2x2x1
jax: 0.10.0
libtpu: 0.0.40
codegen_flags: <defaults>
</compile_context>

<pallas_src>
import functools
import math

import jax
import jax.numpy as jnp
from jax import lax
from jax.experimental import pallas as pl
from jax.experimental.pallas import tpu as pltpu


def _arcnet_kernel(x_ref, w_ref, label_ref, out_ref, *, s, cos_m, sin_m):
    eps = 1e-12
    B, D = x_ref.shape
    C = w_ref.shape[0]
    inv_s = 1.0 / s
    inv_batch = 1.0 / B

    x = x_ref[...].astype(jnp.float32)        # (B, D)
    w = w_ref[...].astype(jnp.float32)        # (C, D), whole weight in VMEM
    labels = label_ref[...]                   # (B, 1) int32

    # ---- L2 normalization of the embeddings (F.normalize dim=1, eps=1e-12). ----
    # rsqrt(max(sum_sq, eps^2)) == 1 / max(||row||, eps); single EUP op per row.
    x_sq = jnp.sum(x * x, axis=1, keepdims=True)
    emb = x * lax.rsqrt(jnp.maximum(x_sq, eps * eps))

    # ---- Gather the B label rows of w with a one-hot MXU matmul. ----
    # (B, C) one-hot @ (C, D) -> (B, D); exact row selection, no dynamic slices.
    class_ids = lax.broadcasted_iota(jnp.int32, (B, C), dimension=1)
    onehot = (class_ids == labels).astype(jnp.float32)
    wg = jnp.dot(onehot, w, preferred_element_type=jnp.float32)      # (B, D)

    # ---- Normalize only the gathered rows (O(B*D) instead of O(C*D)). ----
    w_sq = jnp.sum(wg * wg, axis=1, keepdims=True)
    w_n = wg * lax.rsqrt(jnp.maximum(w_sq, eps * eps))

    # ---- Per-sample cosine with its own label row, ArcFace margin, loss. ----
    # One-hot selection commutes with the elementwise chain, so the sqrt/exp
    # work is (B,1) instead of (B,C).
    picked_cos = jnp.sum(emb * w_n, axis=1, keepdims=True) * inv_s   # (B, 1)
    sin_theta = jnp.sqrt(jnp.maximum(1.0 - picked_cos * picked_cos, 0.0))
    cos_theta_m = picked_cos * cos_m - sin_theta * sin_m
    top = jnp.exp(cos_theta_m * s)                                   # (B, 1)

    # NLLLoss(mean) on `top`: -mean_i top[i, label[i]].  Scalar goes to SMEM.
    out_ref[0, 0] = -jnp.sum(top) * inv_batch


def arcnet_loss(x, w, label, *, s=20.0, m=0.1):
    """x: (B, D) f32, w: (C, D) f32, label: (B,) int -> scalar f32 loss."""
    B, D = x.shape
    C, D2 = w.shape
    assert D == D2
    label2d = label.astype(jnp.int32).reshape(B, 1)

    kernel = functools.partial(
        _arcnet_kernel,
        s=float(s),
        cos_m=float(math.cos(m)),
        sin_m=float(math.sin(m)),
    )

    out = pl.pallas_call(
        kernel,
        out_shape=jax.ShapeDtypeStruct((1, 1), jnp.float32),
        grid=(1,),
        in_specs=[
            pl.BlockSpec((B, D), lambda i: (0, 0)),   # x fully in VMEM
            pl.BlockSpec((C, D), lambda i: (0, 0)),   # whole w: one contiguous DMA
            pl.BlockSpec((B, 1), lambda i: (0, 0)),   # labels as a tiny VMEM column
        ],
        out_specs=pl.BlockSpec(memory_space=pltpu.MemorySpace.SMEM),
        compiler_params=pltpu.CompilerParams(
            dimension_semantics=("arbitrary",)),
    )(x, w, label2d)
    return out[0, 0]


def arcnet_loss_ref(x, w, label, *, s=20.0, m=0.1):
    """Pure-JAX reference mirroring the PyTorch forward."""
    eps = 1e-12
    emb = x / jnp.maximum(jnp.linalg.norm(x, axis=1, keepdims=True), eps)
    w_n = w / jnp.maximum(jnp.linalg.norm(w, axis=1, keepdims=True), eps)
    cos_theta = (emb @ w_n.T) / s
    sin_theta = jnp.sqrt(1.0 - cos_theta ** 2)
    cos_theta_m = cos_theta * jnp.cos(m) - sin_theta * jnp.sin(m)
    top = jnp.exp(cos_theta_m * s)
    picked = top[jnp.arange(x.shape[0]), label]
    return -jnp.mean(picked)


if __name__ == "__main__":
    # Module defaults: num_classes=576, latent_dim=128; small batch.
    num_classes, latent_dim, batch = 576, 128, 8
    s, m = 20.0, 0.1

    key = jax.random.PRNGKey(0)
    kx, kw, kl = jax.random.split(key, 3)

    x = jax.random.normal(kx, (batch, latent_dim), dtype=jnp.float32)

    # xavier_uniform_ for w of shape (num_classes, latent_dim)
    bound = math.sqrt(6.0 / (num_classes + latent_dim))
    w = jax.random.uniform(kw, (num_classes, latent_dim),
                           minval=-bound, maxval=bound, dtype=jnp.float32)

    label = jax.random.randint(kl, (batch,), 0, num_classes, dtype=jnp.int32)

    loss = arcnet_loss(x, w, label, s=s, m=m)
    jax.block_until_ready(loss)

    ref = arcnet_loss_ref(x, w, label, s=s, m=m)
    assert jnp.allclose(loss, ref, rtol=1e-5, atol=1e-5), (loss, ref)

    print("KERNEL_OK")
</pallas_src>

<mosaic_0001>
module attributes {stable_mosaic.version = 11 : i64} {
  func.func @_arcnet_kernel(%arg0: i32, %arg1: memref<8x128xf32, #tpu.memory_space<vmem>>, %arg2: memref<576x128xf32, #tpu.memory_space<vmem>>, %arg3: memref<8x1xi32, #tpu.memory_space<vmem>>, %arg4: memref<1x1xf32, #tpu.memory_space<smem>>) attributes {dimension_semantics = [#tpu.dimension_semantics<arbitrary>], iteration_bounds = array<i64: 1>, scalar_prefetch = 0 : i64, scratch_operands = 0 : i64, tpu.core_type = #tpu.core_type<tc>, window_params = [{pipeline_mode = #tpu.pipeline_mode<synchronous>, transform_indices = @transform_0, window_bounds = array<i64: 8, 128>}, {pipeline_mode = #tpu.pipeline_mode<synchronous>, transform_indices = @transform_1, window_bounds = array<i64: 576, 128>}, {pipeline_mode = #tpu.pipeline_mode<synchronous>, transform_indices = @transform_2, window_bounds = array<i64: 8, 1>}, {transform_indices = @transform_3, window_bounds = array<i64: 1, 1>}]} {
    %c0 = arith.constant 0 : index
    %c0_0 = arith.constant 0 : index
    %0 = vector.load %arg1[%c0, %c0_0] : memref<8x128xf32, #tpu.memory_space<vmem>>, vector<8x128xf32>
    %c0_1 = arith.constant 0 : index
    %c0_2 = arith.constant 0 : index
    %1 = vector.load %arg2[%c0_1, %c0_2] : memref<576x128xf32, #tpu.memory_space<vmem>>, vector<576x128xf32>
    %c0_3 = arith.constant 0 : index
    %c0_4 = arith.constant 0 : index
    %2 = vector.load %arg3[%c0_3, %c0_4] : memref<8x1xi32, #tpu.memory_space<vmem>>, vector<8x1xi32>
    %3 = arith.mulf %0, %0 : vector<8x128xf32>
    %cst = arith.constant dense<0.000000e+00> : vector<8xf32>
    %4 = vector.multi_reduction <add>, %3, %cst [1] : vector<8x128xf32> to vector<8xf32>
    %5 = vector.shape_cast %4 : vector<8xf32> to vector<8x1xf32>
    %cst_5 = arith.constant 1.000000e-24 : f32
    %6 = vector.broadcast %cst_5 : f32 to vector<8x1xf32>
    %7 = arith.maximumf %5, %6 : vector<8x1xf32>
    %8 = math.rsqrt %7 : vector<8x1xf32>
    %9 = vector.broadcast %8 : vector<8x1xf32> to vector<8x128xf32>
    %10 = arith.mulf %0, %9 : vector<8x128xf32>
    %11 = tpu.iota {dimensions = array<i32: 1>} : vector<8x576xi32>
    %12 = vector.broadcast %2 : vector<8x1xi32> to vector<8x576xi32>
    %13 = arith.cmpi eq, %11, %12 : vector<8x576xi32>
    %14 = arith.extui %13 : vector<8x576xi1> to vector<8x576xi32>
    %15 = arith.sitofp %14 : vector<8x576xi32> to vector<8x576xf32>
    %cst_6 = arith.constant dense<0.000000e+00> : vector<8x128xf32>
    %16 = tpu.matmul %15, %1, %cst_6 {dimension_numbers = #tpu.dot_dimension_numbers<[1], [0], [0], [1], [0, 0, 1, 1], [], []>} : vector<8x576xf32>, vector<576x128xf32>, vector<8x128xf32> -> vector<8x128xf32>
    %17 = arith.mulf %16, %16 : vector<8x128xf32>
    %cst_7 = arith.constant dense<0.000000e+00> : vector<8xf32>
    %18 = vector.multi_reduction <add>, %17, %cst_7 [1] : vector<8x128xf32> to vector<8xf32>
    %19 = vector.shape_cast %18 : vector<8xf32> to vector<8x1xf32>
    %cst_8 = arith.constant 1.000000e-24 : f32
    %20 = vector.broadcast %cst_8 : f32 to vector<8x1xf32>
    %21 = arith.maximumf %19, %20 : vector<8x1xf32>
    %22 = math.rsqrt %21 : vector<8x1xf32>
    %23 = vector.broadcast %22 : vector<8x1xf32> to vector<8x128xf32>
    %24 = arith.mulf %16, %23 : vector<8x128xf32>
    %25 = arith.mulf %10, %24 : vector<8x128xf32>
    %cst_9 = arith.constant dense<0.000000e+00> : vector<8xf32>
    %26 = vector.multi_reduction <add>, %25, %cst_9 [1] : vector<8x128xf32> to vector<8xf32>
    %27 = vector.shape_cast %26 : vector<8xf32> to vector<8x1xf32>
    %cst_10 = arith.constant 5.000000e-02 : f32
    %28 = vector.broadcast %cst_10 : f32 to vector<8x1xf32>
    %29 = arith.mulf %27, %28 : vector<8x1xf32>
    %30 = arith.mulf %29, %29 : vector<8x1xf32>
    %cst_11 = arith.constant 1.000000e+00 : f32
    %31 = vector.broadcast %cst_11 : f32 to vector<8x1xf32>
    %32 = arith.subf %31, %30 : vector<8x1xf32>
    %cst_12 = arith.constant 0.000000e+00 : f32
    %33 = vector.broadcast %cst_12 : f32 to vector<8x1xf32>
    %34 = arith.maximumf %32, %33 : vector<8x1xf32>
    %35 = math.sqrt %34 : vector<8x1xf32>
    %cst_13 = arith.constant 0.995004177 : f32
    %36 = vector.broadcast %cst_13 : f32 to vector<8x1xf32>
    %37 = arith.mulf %29, %36 : vector<8x1xf32>
    %cst_14 = arith.constant 0.0998334139 : f32
    %38 = vector.broadcast %cst_14 : f32 to vector<8x1xf32>
    %39 = arith.mulf %35, %38 : vector<8x1xf32>
    %40 = arith.subf %37, %39 : vector<8x1xf32>
    %cst_15 = arith.constant 2.000000e+01 : f32
    %41 = vector.broadcast %cst_15 : f32 to vector<8x1xf32>
    %42 = arith.mulf %40, %41 : vector<8x1xf32>
    %43 = math.exp %42 : vector<8x1xf32>
    %44 = vector.shape_cast %43 : vector<8x1xf32> to vector<1x8x1xf32>
    %cst_16 = arith.constant dense<0.000000e+00> : vector<1xf32>
    %45 = vector.multi_reduction <add>, %44, %cst_16 [1, 2] : vector<1x8x1xf32> to vector<1xf32>
    %46 = vector.shape_cast %45 : vector<1xf32> to vector<1x1x1xf32>
    %47 = vector.extract %46[0, 0, 0] : f32 from vector<1x1x1xf32>
    %cst_17 = arith.constant 0.000000e+00 : f32
    %48 = arith.subf %cst_17, %47 : f32
    %cst_18 = arith.constant 1.250000e-01 : f32
    %49 = arith.mulf %48, %cst_18 : f32
    %c0_19 = arith.constant 0 : index
    %c0_20 = arith.constant 0 : index
    %50 = memref.load %arg4[%c0_19, %c0_20] : memref<1x1xf32, #tpu.memory_space<smem>>
    memref.store %49, %arg4[%c0_19, %c0_20] : memref<1x1xf32, #tpu.memory_space<smem>>
    return
  }
  func.func @transform_0(%arg0: i32) -> (i32, i32) {
    %c0_i32 = arith.constant 0 : i32
    %c0_i32_0 = arith.constant 0 : i32
    %c0_i32_1 = arith.constant 0 : i32
    return %c0_i32, %c0_i32_0 : i32, i32
  }
  func.func @transform_1(%arg0: i32) -> (i32, i32) {
    %c0_i32 = arith.constant 0 : i32
    %c0_i32_0 = arith.constant 0 : i32
    %c0_i32_1 = arith.constant 0 : i32
    return %c0_i32, %c0_i32_0 : i32, i32
  }
  func.func @transform_2(%arg0: i32) -> (i32, i32) {
    %c0_i32 = arith.constant 0 : i32
    %c0_i32_0 = arith.constant 0 : i32
    %c0_i32_1 = arith.constant 0 : i32
    return %c0_i32, %c0_i32_0 : i32, i32
  }
  func.func @transform_3(%arg0: i32) -> (i32, i32) {
    %c0_i32 = arith.constant 0 : i32
    %c0_i32_0 = arith.constant 0 : i32
    %c0_i32_1 = arith.constant 0 : i32
    return %c0_i32, %c0_i32_0 : i32, i32
  }
}

</mosaic_0001>

<bundles_post_ra>
// kernel: tpu_custom_call.1
= control target key start
LH: loop header
LB: loop body
LE: loop exit
PB: predicated region body
PF: predicated region fallthrough
CT: control target
= control target key end

     0   :  { %8 = vsyncpa [#allocation3], 0  ;;  %s601_s0 = inlined_call_operand.vmem [shape: f32[8,128], index: 0, kind: input, shape index: {}]   ;;  %s602_s1 = inlined_call_operand.hbm [shape: f32[576,128], index: 1, kind: input, shape index: {}]   ;;  %s603_s2 = inlined_call_operand.vmem [shape: s32[8,1], index: 2, kind: input, shape index: {}]   ;;  %s604_s3 = inlined_call_operand.hbm [shape: f32[1,1], index: 3, kind: output, shape index: {}]  }
   0x1   :  { %9 = vsyncpa [#allocation4], 0  ;;  %s561_s12 = smov [#allocation2]  }
   0x2   :  { %s17_s13 = sshll.u32 %s561_s12, 4  ;;  %s18_s13 = int_to_ptr.vmem [resolvable:$true] %s17_s13 }
   0x3   :  { %s537_s14 = scalar_lea.vmem %s18_s13, 9216  ;;  %p542_p1 = scmp.lt.s32.totalorder %s18_s13, %s18_s13 }
   0x4   :  { %p538_p0 = scmp.ne.s32.totalorder %s18_s13, %s537_s14  ;;  %p543_p2 = scmp.lt.s32.totalorder %s537_s14, %s537_s14 }
   0x6   :  { %p544_p3 = por %p543_p2, %p542_p1 }
   0x8   :  { %p545_p4 = pnand %p544_p3, %p538_p0 }
   0xa   :  { %548 = shalt.err (!%p545_p4)
}
   0xb   :  { %s562_s15 = smov 128   ;;  %s563_s16 = smov 8  }
   0xc   :  { %23 = dma.hbm_to_vmem [thread:$0]  %s602_s1, 9216, %s18_s13, [#allocation3], %s562_s15, %s562_s15, %s563_s16  }
   0xd   :  { %557 = dma.done.wait [#allocation3], 9216  }
   0xe   :  { %558 = vsyncadd [#allocation3], 4294958080  ;;  %v564_v0 = vmov 0   ;;  %v102_v1 = vld [vmem:[%s603_s2] sm:$0xff]  ;;  %v61_v2 = vld [vmem:[#allocation2 + $0xf8] sm:$0xff]  ;;  %vm567_vm4 = vmmov 0  }
   0xf   :  { %520 = vset.pattern.permute.xlu0 %v564_v0  ;;  %v45_v3 = vld [vmem:[#allocation2 + $0x78] sm:$0xff]  ;;  %412 = vmatprep.subr.mxu0 %v61_v2  ;;  %v60_v5 = vld [vmem:[#allocation2 + $0xf0] sm:$0xff]  ;;  %v59_v9 = vld [vmem:[#allocation2 + $0xe8] sm:$0xff]  ;;  %v565_v2 = vmov 0.0   ;;  %vm133_vm6 = vcmask 523264   ;;  %vm373_vm9 = vcmask 7168  }
  0x10   :  { %116 = vperm.xlu0 %520, %v102_v1   ;;  %v93_v4 = vld [vmem:[#allocation2 + $0x1f8] sm:$0xff]  ;;  %413 = vmatpush3.msra.mxu0 %v45_v3  ;;  %v44_v7 = vld [vmem:[#allocation2 + $0x70] sm:$0xff]  ;;  %v43_v11 = vld [vmem:[#allocation2 + $0x68] sm:$0xff]  ;;  %v109_v3 = vlaneseq  ;;  %s568_s23 = smov [#allocation5]  }
  0x11   :  { %v77_v6 = vld [vmem:[#allocation2 + $0x178] sm:$0xff]  ;;  %447 = vmatprep.subr.mxu1 %v93_v4  ;;  %v92_v8 = vld [vmem:[#allocation2 + $0x1f0] sm:$0xff]  ;;  %414 = vmatprep.subr.mxu0 %v60_v5  ;;  %v91_v12 = vld [vmem:[#allocation2 + $0x1e8] sm:$0xff] }
  0x12   :  { %448 = vmatpush3.msra.mxu1 %v77_v6  ;;  %v76_v10 = vld [vmem:[#allocation2 + $0x170] sm:$0xff]  ;;  %415 = vmatpush3.msra.mxu0 %v44_v7  ;;  %v58_v13 = vld [vmem:[#allocation2 + $0xe0] sm:$0xff]  ;;  %v75_v14 = vld [vmem:[#allocation2 + $0x168] sm:$0xff]  ;;  %v110_v4 = vand.u32 127, %v109_v3 }
  0x13   :  { %449 = vmatprep.subr.mxu1 %v92_v8  ;;  %416 = vmatprep.subr.mxu0 %v59_v9  ;;  %v42_v15 = vld [vmem:[#allocation2 + $0x60] sm:$0xff]  ;;  %v57_v17 = vld [vmem:[#allocation2 + $0xd8] sm:$0xff]  ;;  %v56_v21 = vld [vmem:[#allocation2 + $0xd0] sm:$0xff] }
  0x14   :  { %450 = vmatpush3.msra.mxu1 %v76_v10  ;;  %v90_v16 = vld [vmem:[#allocation2 + $0x1e0] sm:$0xff]  ;;  %417 = vmatpush3.msra.mxu0 %v43_v11  ;;  %v41_v19 = vld [vmem:[#allocation2 + $0x58] sm:$0xff]  ;;  %v40_v23 = vld [vmem:[#allocation2 + $0x50] sm:$0xff]  ;;  %v111_v5 = vadd.s32 128, %v110_v4  ;;  %v113_v6 = vadd.s32 384, %v110_v4  ;;  %v112_v7 = vadd.s32 256, %v110_v4 }
  0x15   :  { %451 = vmatprep.subr.mxu1 %v91_v12  ;;  %v74_v18 = vld [vmem:[#allocation2 + $0x160] sm:$0xff]  ;;  %418 = vmatprep.subr.mxu0 %v58_v13  ;;  %v89_v20 = vld [vmem:[#allocation2 + $0x1d8] sm:$0xff]  ;;  %v88_v24 = vld [vmem:[#allocation2 + $0x1d0] sm:$0xff]  ;;  %v566_v10 = vmov 1.0  }
  0x16   :  { %452 = vmatpush3.msra.mxu1 %v75_v14  ;;  %419 = vmatpush3.msra.mxu0 %v42_v15  ;;  %v73_v22 = vld [vmem:[#allocation2 + $0x158] sm:$0xff]  ;;  %v55_v25 = vld [vmem:[#allocation2 + $0xc8] sm:$0xff]  ;;  %v72_v26 = vld [vmem:[#allocation2 + $0x150] sm:$0xff] }
  0x17   :  { %453 = vmatprep.subr.mxu1 %v90_v16  ;;  %420 = vmatprep.subr.mxu0 %v57_v17  ;;  %v39_v27 = vld [vmem:[#allocation2 + $0x48] sm:$0xff]  ;;  %v54_v29 = vld [vmem:[#allocation2 + $0xc0] sm:$0xff]  ;;  %v53_v33 = vld [vmem:[#allocation2 + $0xb8] sm:$0xff]  ;;  %v114_v16 = vadd.s32 512, %v110_v4 }
  0x18   :  { %454 = vmatpush3.msra.mxu1 %v74_v18  ;;  %421 = vmatpush3.msra.mxu0 %v41_v19  ;;  %v87_v28 = vld [vmem:[#allocation2 + $0x1c8] sm:$0xff]  ;;  %v38_v31 = vld [vmem:[#allocation2 + $0x40] sm:$0xff]  ;;  %v37_v35 = vld [vmem:[#allocation2 + $0x38] sm:$0xff] }
  0x19   :  { %455 = vmatprep.subr.mxu1 %v89_v20  ;;  %422 = vmatprep.subr.mxu0 %v56_v21  ;;  %v71_v30 = vld [vmem:[#allocation2 + $0x148] sm:$0xff]  ;;  %v86_v32 = vld [vmem:[#allocation2 + $0x1c0] sm:$0xff]  ;;  %v85_v36 = vld [vmem:[#allocation2 + $0x1b8] sm:$0xff] }
  0x1a   :  { %456 = vmatpush3.msra.mxu1 %v73_v22  ;;  %423 = vmatpush3.msra.mxu0 %v40_v23  ;;  %v70_v34 = vld [vmem:[#allocation2 + $0x140] sm:$0xff]  ;;  %v52_v37 = vld [vmem:[#allocation2 + $0xb0] sm:$0xff]  ;;  %v69_v38 = vld [vmem:[#allocation2 + $0x138] sm:$0xff] }
  0x1b   :  { %457 = vmatprep.subr.mxu1 %v88_v24  ;;  %424 = vmatprep.subr.mxu0 %v55_v25  ;;  %v36_v39 = vld [vmem:[#allocation2 + $0x30] sm:$0xff]  ;;  %v51_v41 = vld [vmem:[#allocation2 + $0xa8] sm:$0xff]  ;;  %v50_v45 = vld [vmem:[#allocation2 + $0xa0] sm:$0xff] }
  0x1c   :  { %458 = vmatpush3.msra.mxu1 %v72_v26  ;;  %425 = vmatpush3.msra.mxu0 %v39_v27  ;;  %v84_v40 = vld [vmem:[#allocation2 + $0x1b0] sm:$0xff]  ;;  %v35_v43 = vld [vmem:[#allocation2 + $0x28] sm:$0xff]  ;;  %v34_v47 = vld [vmem:[#allocation2 + $0x20] sm:$0xff] }
  0x1d   :  { %459 = vmatprep.subr.mxu1 %v87_v28  ;;  %426 = vmatprep.subr.mxu0 %v54_v29  ;;  %v68_v42 = vld [vmem:[#allocation2 + $0x130] sm:$0xff]  ;;  %v83_v44 = vld [vmem:[#allocation2 + $0x1a8] sm:$0xff]  ;;  %v82_v48 = vld [vmem:[#allocation2 + $0x1a0] sm:$0xff] }
  0x1e   :  { %460 = vmatpush3.msra.mxu1 %v71_v30  ;;  %427 = vmatpush3.msra.mxu0 %v38_v31  ;;  %v67_v46 = vld [vmem:[#allocation2 + $0x128] sm:$0xff]  ;;  %v49_v49 = vld [vmem:[#allocation2 + $0x98] sm:$0xff]  ;;  %v66_v50 = vld [vmem:[#allocation2 + $0x120] sm:$0xff] }
  0x1f   :  { %461 = vmatprep.subr.mxu1 %v86_v32  ;;  %428 = vmatprep.subr.mxu0 %v53_v33  ;;  %v33_v51 = vld [vmem:[#allocation2 + $0x18] sm:$0xff]  ;;  %v48_v53 = vld [vmem:[#allocation2 + $0x90] sm:$0xff]  ;;  %v47_v57 = vld [vmem:[#allocation2 + $0x88] sm:$0xff] }
  0x20   :  { %462 = vmatpush3.msra.mxu1 %v70_v34  ;;  %429 = vmatpush3.msra.mxu0 %v37_v35  ;;  %v81_v52 = vld [vmem:[#allocation2 + $0x198] sm:$0xff]  ;;  %v32_v55 = vld [vmem:[#allocation2 + $0x10] sm:$0xff]  ;;  %v31_v59 = vld [vmem:[#allocation2 + $0x8] sm:$0xff] }
  0x21   :  { %463 = vmatprep.subr.mxu1 %v85_v36  ;;  %430 = vmatprep.subr.mxu0 %v52_v37  ;;  %v65_v54 = vld [vmem:[#allocation2 + $0x118] sm:$0xff]  ;;  %v80_v56 = vld [vmem:[#allocation2 + $0x190] sm:$0xff]  ;;  %v79_v60 = vld [vmem:[#allocation2 + $0x188] sm:$0xff] }
  0x22   :  { %464 = vmatpush3.msra.mxu1 %v69_v38  ;;  %431 = vmatpush3.msra.mxu0 %v36_v39  ;;  %v64_v58 = vld [vmem:[#allocation2 + $0x110] sm:$0xff]  ;;  %v46_v61 = vld [vmem:[#allocation2 + $0x80] sm:$0xff]  ;;  %v63_v62 = vld [vmem:[#allocation2 + $0x108] sm:$0xff] }
  0x23   :  { %465 = vmatprep.subr.mxu1 %v84_v40  ;;  %432 = vmatprep.subr.mxu0 %v51_v41  ;;  %v30_v63 = vld [vmem:[#allocation2] sm:$0xff]  ;;  %v101_v9 = vld [vmem:[#allocation2 + $0x238] sm:$0xff]  ;;  %v100_v11 = vld [vmem:[#allocation2 + $0x230] sm:$0xff] }
  0x24   :  { %466 = vmatpush3.msra.mxu1 %v68_v42  ;;  %433 = vmatpush3.msra.mxu0 %v35_v43  ;;  %v78_v0 = vld [vmem:[#allocation2 + $0x180] sm:$0xff]  ;;  %v99_v12 = vld [vmem:[#allocation2 + $0x228] sm:$0xff]  ;;  %v97_v14 = vld [vmem:[#allocation2 + $0x218] sm:$0xff] }
  0x25   :  { %467 = vmatprep.subr.mxu1 %v83_v44  ;;  %434 = vmatprep.subr.mxu0 %v50_v45  ;;  %v62_v1 = vld [vmem:[#allocation2 + $0x100] sm:$0xff]  ;;  %v96_v15 = vld [vmem:[#allocation2 + $0x210] sm:$0xff]  ;;  %v95_v17 = vld [vmem:[#allocation2 + $0x208] sm:$0xff] }
  0x26   :  { %468 = vmatpush3.msra.mxu1 %v67_v46  ;;  %435 = vmatpush3.msra.mxu0 %v34_v47  ;;  %v98_v13 = vld [vmem:[#allocation2 + $0x220] sm:$0xff] }
  0x27   :  { %469 = vmatprep.subr.mxu1 %v82_v48  ;;  %436 = vmatprep.subr.mxu0 %v49_v49  ;;  %v94_v18 = vld [vmem:[#allocation2 + $0x200] sm:$0xff] }
  0x28   :  { %470 = vmatpush3.msra.mxu1 %v66_v50  ;;  %437 = vmatpush3.msra.mxu0 %v33_v51  ;;  %v29_v20 = vld [vmem:[%s601_s0] sm:$0xff] }
  0x29   :  { %471 = vmatprep.subr.mxu1 %v81_v52  ;;  %438 = vmatprep.subr.mxu0 %v48_v53  ;;  %v103_v21 = vmul.f32 %v29_v20, %v29_v20 }
  0x2a   :  { %472 = vmatpush3.msra.mxu1 %v65_v54  ;;  %439 = vmatpush3.msra.mxu0 %v32_v55 }
  0x2b   :  { %473 = vmatprep.subr.mxu1 %v80_v56  ;;  %440 = vmatprep.subr.mxu0 %v47_v57 }
  0x2c   :  { %474 = vmatpush3.msra.mxu1 %v64_v58  ;;  %441 = vmatpush3.msra.mxu0 %v31_v59 }
  0x2d   :  { %475 = vmatprep.subr.mxu1 %v79_v60  ;;  %442 = vmatprep.subr.mxu0 %v46_v61 }
  0x2e   :  { %476 = vmatpush3.msra.mxu1 %v63_v62  ;;  %443 = vmatpush3.msra.mxu0 %v30_v63 }
  0x2f   :  { %477 = vmatprep.subr.mxu1 %v78_v0  ;;  %491 = vmatprep.subr.mxu0 %v565_v2 }
  0x30   :  { %478 = vmatpush3.msra.mxu1 %v62_v1  ;;  %104 = vadd.xlane.f32.xlu0 %v103_v21 }
  0x8b   :  { %v117_v8 = vpop.permute.xlu0 %116 }
  0x8c   :  { %vm119_vm0 = vcmp.eq.s32.totalorder %v111_v5, %v117_v8  ;;  %vm121_vm1 = vcmp.eq.s32.totalorder %v113_v6, %v117_v8  ;;  %vm118_vm2 = vcmp.eq.s32.totalorder %v110_v4, %v117_v8  ;;  %vm120_vm3 = vcmp.eq.s32.totalorder %v112_v7, %v117_v8 }
  0x8d   :  { %407 = vmatprep.mubr.msk.f32.mxu0 %vm119_vm0, %v566_v10  ;;  %409 = vmatprep.mubr.msk.f32.mxu1 %vm121_vm1, %v566_v10  ;;  %vm122_vm5 = vcmp.eq.s32.totalorder %v114_v16, %v117_v8 }
  0x8e   :  { %408 = vmatmul.mubr.msk.f32.vlgmr.msra.gmra.mxu0 %vm118_vm2, %v566_v10  ;;  %410 = vmatmul.mubr.msk.f32.vlgmr.msra.gmra.mxu1 %vm120_vm3, %v566_v10  ;;  %v406_v19 = vsel %vm122_vm5, 1.0, %v565_v2 }
  0x8f   :  { %492 = vmatpush3.msra.mxu0 %v101_v9  ;;  %507 = vmatprep.mubr.msk.f32.mxu0 %vm567_vm4, %v565_v2 }
  0x90   :  { %493 = vmatprep.subr.mxu0 %v565_v2 }
  0x91   :  { %494 = vmatpush3.msra.mxu0 %v100_v11 }
  0x92   :  { %495 = vmatprep.subr.mxu0 %v565_v2 }
  0x93   :  { %496 = vmatpush3.msra.mxu0 %v99_v12 }
  0x94   :  { %497 = vmatprep.subr.mxu0 %v565_v2 }
  0x95   :  { %498 = vmatpush3.msra.mxu0 %v98_v13 }
  0x96   :  { %499 = vmatprep.subr.mxu0 %v565_v2 }
  0x97   :  { %500 = vmatpush3.msra.mxu0 %v97_v14 }
  0x98   :  { %501 = vmatprep.subr.mxu0 %v565_v2 }
  0x99   :  { %502 = vmatpush3.msra.mxu0 %v96_v15 }
  0x9a   :  { %503 = vmatprep.subr.mxu0 %v565_v2 }
  0x9b   :  { %504 = vmatpush3.msra.mxu0 %v95_v17 }
  0x9c   :  { %505 = vmatprep.subr.mxu0 %v565_v2 }
  0x9d   :  { %506 = vmatpush3.msra.mxu0 %v94_v18 }
  0x9e   :  { %508 = vmatmul.mubr.msk.f32.vlgmr.msra.gmra.mxu0 %vm133_vm6, %v406_v19 }
  0xb9   :  { %v105_v33 = vpop.xlane.xlu0 %104 }
  0xba   :  { %v106_v34 = vmax.f32 %v105_v33, 1e-24 }
  0xbc   :  { %521 = vrsqrt.f32 %v106_v34 }
  0xc9   :  { %v522_v37 = vpop.eup %521 }
  0xca   :  { %v108_v38 = vmul.f32 %v522_v37, %v29_v20 }
 0x14e   :  { %v444_v22 = vpop.f32.mrf.mxu0  ;;  %v479_v23 = vpop.f32.mrf.mxu1 }
 0x150   :  { %v445_v24 = vpop.f32.mrf.mxu0  ;;  %v480_v25 = vpop.f32.mrf.mxu1 }
 0x151   :  { %v446_v26 = vadd.f32 %v445_v24, %v444_v22  ;;  %v481_v27 = vadd.f32 %v480_v25, %v479_v23 }
 0x153   :  { %v274_v28 = vadd.f32 %v481_v27, %v446_v26 }
 0x15e   :  { %v343_v29 = vpop.f32.mrf.mxu0 }
 0x15f   :  { %v344_v30 = vadd.f32 %v343_v29, %v274_v28 }
 0x160   :  { %v509_v31 = vpop.f32.mrf.mxu0 }
 0x161   :  { %v347_v32 = vmul.f32 %v344_v30, %v344_v30 }
 0x163   :  { %348 = vadd.xlane.f32.xlu1 %v347_v32 }
 0x1ec   :  { %v349_v35 = vpop.xlane.xlu1 %348 }
 0x1ed   :  { %v350_v36 = vmax.f32 %v349_v35, 1e-24 }
 0x1ef   :  { %523 = vrsqrt.f32 %v350_v36 }
 0x1fc   :  { %v524_v39 = vpop.eup %523 }
 0x1fd   :  { %v352_v40 = vmul.f32 %v524_v39, %v344_v30 }
 0x1ff   :  { %v353_v41 = vmul.f32 %v352_v40, %v108_v38 }
 0x201   :  { %354 = vadd.xlane.f32.xlu1 %v353_v41 }
 0x28a   :  { %v355_v42 = vpop.xlane.xlu1 %354 }
 0x28b   :  { %v356_v43 = vmul.f32 0.05, %v355_v42 }
 0x28d   :  { %v357_v44 = vmul.f32 %v356_v43, %v356_v43  ;;  %v367_v52 = vmul.f32 0.9950042, %v356_v43 }
 0x28f   :  { %v358_v45 = vsub.f32 1.0, %v357_v44 }
 0x291   :  { %v359_v46 = vmax.f32 %v358_v45, 0.0 }
 0x293   :  { %525 = vrsqrt.f32 %v359_v46  ;;  %vm362_vm7 = vcmp.eq.f32.partialorder %v359_v46, inf  ;;  %v365_v49 = vand.u32 2147483648, %v359_v46  ;;  %vm364_vm8 = vcmp.eq.f32.partialorder %v359_v46, 0.0 }
 0x2a0   :  { %v526_v47 = vpop.eup %525 }
 0x2a1   :  { %v361_v48 = vmul.f32 %v526_v47, %v359_v46 }
 0x2a3   :  { %v363_v50 = vsel %vm362_vm7, %v359_v46, %v361_v48 }
 0x2a4   :  { %v366_v51 = vsel %vm364_vm8, %v365_v49, %v363_v50 }
 0x2a5   :  { %v368_v53 = vmul.f32 0.099833414, %v366_v51 }
 0x2a7   :  { %v369_v54 = vsub.f32 %v367_v52, %v368_v53 }
 0x2a9   :  { %v370_v55 = vmul.f32 20.0, %v369_v54 }
 0x2ab   :  { %v371_v56 = vmul.f32 1.442695, %v370_v55 }
 0x2ad   :  { %527 = vpow2.f32 %v371_v56 }
 0x2ba   :  { %v528_v57 = vpop.eup %527 }
 0x2bb   :  { %v374_v58 = vsel %vm373_vm9, %v528_v57, 0.0 }
 0x2bc   :  { %375 = vadd.xlane.f32.xlu1 %v374_v58 }
 0x345   :  { %v376_v59 = vpop.xlane.xlu1 %375 }
 0x346   :  { %v377_v60 = vrot.slane %v376_v59, 4 }
 0x348   :  { %v378_v61 = vadd.f32 %v377_v60, %v376_v59 }
 0x34a   :  { %v379_v62 = vrot.slane %v378_v61, 2 }
 0x34c   :  { %v380_v63 = vadd.f32 %v379_v62, %v378_v61 }
 0x34e   :  { %v381_v0 = vrot.slane %v380_v63, 1 }
 0x350   :  { %v382_v1 = vadd.f32 %v381_v0, %v380_v63 }
 0x352   :  { %510 = vpush %v382_v1 }
 0x383   :  { %s511_s0 = spop %510 }
 0x384   :  { %s384_s21 = ssub.f32 0.0, %s511_s0 }
 0x386   :  { %s385_s22 = smul.f32 0.125, %s384_s21 }
 0x388   :  { %387 = sst [smem:[#allocation5]] %s385_s22 }
 0x389   :  { %395 = dma.smem_to_hbm %s568_s23, 16, %s604_s3, [#allocation4]  }
 0x38a   :  { %559 = dma.done.wait [#allocation4], 16  }
 0x38b   :  { %560 = vsyncadd [#allocation4], 4294967280 }
 0x38c   :  { %399 = sfence }
 0x38d   :  { %400 = vsyncpa [#allocation3], 1 }
 0x38e   :  { %401 = vsyncpa [#allocation4], 1 }

</bundles_post_ra>
